<compile_context>
chip_gen: v7x
topology: tpu7x:2x2x1
jax: 0.10.0
libtpu: 0.0.40
codegen_flags: <defaults>
</compile_context>

<pallas_src>
import functools
import math

import jax
import jax.numpy as jnp
from jax import lax
from jax.experimental import pallas as pl
from jax.experimental.pallas import tpu as pltpu

_NUM_CORES = 2      # leading "parallel" grid axis; both TCs on v7x, harmless on v5e/v6e
_LANES = 128


def _round_up(a: int, b: int) -> int:
    return ((a + b - 1) // b) * b


def _sum_log_kernel(x_ref, out_ref, *, c: float, n_valid: int,
                    tile_elems: int, n_inner: int):
    """Accumulate sum(log(x + c)) over this core's slice of the flat input.

    x_ref:   (TB, 128) lane-dense tile of the flattened (padded) input.
    out_ref: (8, 128) f32 per-core partial sum; the output block is resident
             across the 'arbitrary' axis (same block index for every i).
    """
    p = pl.program_id(0)            # core (parallel axis)
    i = pl.program_id(1)            # tile within core (reduction axis)

    @pl.when(i == 0)
    def _():
        out_ref[...] = jnp.zeros_like(out_ref)

    x = x_ref[...].astype(jnp.float32)      # in-VMEM upcast (bf16 inputs ok)
    lx = jnp.log(x + c)                     # one EUP log per element

    tile_idx = p * n_inner + i
    rem = n_valid - tile_idx * tile_elems   # valid elements starting at this tile

    # Steady state: full tile — pure (add, log, vreg-accumulate), no masking.
    @pl.when(rem >= tile_elems)
    def _():
        out_ref[...] += lx.reshape(-1, 8, _LANES).sum(axis=0)

    # Tail / all-padding tiles only: exact mask by global flat index.
    @pl.when(rem < tile_elems)
    def _():
        tb = lx.shape[0]
        flat = (lax.broadcasted_iota(jnp.int32, (tb, _LANES), 0) * _LANES
                + lax.broadcasted_iota(jnp.int32, (tb, _LANES), 1))
        masked = jnp.where(flat < rem, lx, 0.0)
        out_ref[...] += masked.reshape(-1, 8, _LANES).sum(axis=0)


def _vmem_capacity_bytes() -> int:
    try:
        return int(pltpu.get_tpu_info().vmem_capacity_bytes)
    except Exception:
        return 64 * 1024 * 1024          # conservative: v7x has 64 MiB per TC


def _choose_block_rows(total_rows: int, itemsize: int, vmem_cap: int) -> int:
    """Rows (of 128 lanes) per tile: double-buffered input + f32 temps."""
    budget = min(int(vmem_cap * 0.5), 48 * 1024 * 1024)
    bytes_per_row = _LANES * (2 * itemsize + 3 * 4)
    tb = budget // max(bytes_per_row, 1)
    tb = min(tb, 8192, _round_up(max(total_rows, 8), 8))
    return max(8, (tb // 8) * 8)


def nce_criterion(x: jax.Array, targets: jax.Array | None = None, *,
                  nLem: int, eps: float = 1e-7,
                  block_rows: int | None = None) -> jax.Array:
    """Pallas-TPU implementation of NCECriterion.forward. Returns shape (1,)."""
    assert x.ndim == 2 and x.shape[1] >= 2
    B, Kp1 = x.shape
    K = Kp1 - 1
    Pnt = 1.0 / float(nLem)                       # == Pns in the reference
    c = float(K * Pnt + eps)
    const = float(B) * float(K) * math.log(K * Pnt)

    total = B * Kp1
    itemsize = jnp.dtype(x.dtype).itemsize
    vmem_cap = _vmem_capacity_bytes()
    tb = block_rows if block_rows is not None else _choose_block_rows(
        pl.cdiv(total, _LANES), itemsize, vmem_cap)
    assert tb >= 8 and tb % 8 == 0
    tile_elems = tb * _LANES

    num_tiles = _round_up(max(pl.cdiv(total, tile_elems), 1), _NUM_CORES)
    n_inner = num_tiles // _NUM_CORES
    padded = num_tiles * tile_elems

    # Lane-dense relayout: flatten and pad to (num_tiles*tb, 128).  The pad
    # value just keeps the log finite; padded elements are masked exactly in
    # the tail tiles inside the kernel.
    flat = x.reshape(-1)
    if padded != total:
        flat = jnp.pad(flat, (0, padded - total), constant_values=1.0)
    x2d = flat.reshape(num_tiles * tb, _LANES)

    kernel = functools.partial(_sum_log_kernel, c=c, n_valid=total,
                               tile_elems=tile_elems, n_inner=n_inner)

    partials = pl.pallas_call(
        kernel,
        out_shape=jax.ShapeDtypeStruct((_NUM_CORES * 8, _LANES), jnp.float32),
        grid=(_NUM_CORES, n_inner),
        in_specs=[pl.BlockSpec((tb, _LANES),
                               lambda p, i: (p * n_inner + i, 0))],
        out_specs=pl.BlockSpec((8, _LANES), lambda p, i: (p, 0)),
        compiler_params=pltpu.CompilerParams(
            dimension_semantics=("parallel", "arbitrary"),
            vmem_limit_bytes=int(min(vmem_cap * 0.75, 64 * 1024 * 1024))),
    )(x2d)

    # Tiny epilogue (O(B) + O(1)) in XLA, per the folded formula:
    #   loss = (sum_all log(x+c) - sum log(x[:,0]) - B*K*log(K*Pnt)) / B
    s_all = jnp.sum(partials)
    s_x0 = jnp.sum(jnp.log(x[:, 0].astype(jnp.float32)))
    loss = (s_all - s_x0 - const) / float(B)
    return loss.reshape((1,))                     # torch returns shape (1,)


def _reference(x, nLem, eps=1e-7):
    # Literal transcription of the torch forward (un-folded formula).
    x = jnp.asarray(x, jnp.float32)
    B, D = x.shape
    K = D - 1
    Pnt = 1.0 / float(nLem)
    cc = K * Pnt + eps
    ln_pmt = jnp.log(x[:, 0] / (x[:, 0] + cc))
    ln_pon = jnp.log((K * Pnt) / (x[:, 1:] + cc))
    return (-(jnp.sum(ln_pmt) + jnp.sum(ln_pon)) / B).reshape((1,))


if __name__ == "__main__":
    key = jax.random.PRNGKey(0)
    nLem = 128  # memory-bank size

    # Case 1: canonical small shape (B=8, K=16 -> 17 columns), single-tile path.
    B1, Kp1 = 8, 17
    k1, k2, k3, k4 = jax.random.split(key, 4)
    x1 = jax.random.uniform(k1, (B1, Kp1), jnp.float32, minval=0.01, maxval=1.0)
    targets = jax.random.randint(k2, (B1,), 0, nLem)   # unused by the forward
    out1 = jax.block_until_ready(nce_criterion(x1, targets, nLem=nLem))
    ref1 = _reference(x1, nLem)
    assert out1.shape == (1,)
    assert jnp.allclose(out1, ref1, rtol=1e-5, atol=1e-5), (out1, ref1)

    # Case 2: forces several tiles per core plus a partial tail tile
    # (block_rows=8 -> 1024-element tiles; 96*33 = 3168 elements -> 4 tiles,
    #  2 per "core" row of the grid).
    B2, Kp2 = 96, 33
    x2 = jax.random.uniform(k3, (B2, Kp2), jnp.float32, minval=0.01, maxval=1.0)
    out2 = jax.block_until_ready(nce_criterion(x2, None, nLem=nLem, block_rows=8))
    ref2 = _reference(x2, nLem)
    assert jnp.allclose(out2, ref2, rtol=1e-5, atol=1e-5), (out2, ref2)

    # Case 3: bf16 input exercises the in-kernel upcast path.
    x3 = jax.random.uniform(k4, (20, Kp1), jnp.float32,
                            minval=0.01, maxval=1.0).astype(jnp.bfloat16)
    out3 = jax.block_until_ready(nce_criterion(x3, None, nLem=nLem, block_rows=8))
    ref3 = _reference(x3.astype(jnp.float32), nLem)
    assert jnp.allclose(out3, ref3, rtol=1e-4, atol=1e-4), (out3, ref3)

    print("KERNEL_OK")
</pallas_src>

<mosaic_0001>
module attributes {stable_mosaic.version = 11 : i64} {
  func.func @_sum_log_kernel(%arg0: i32, %arg1: i32, %arg2: memref<8x128xf32, #tpu.memory_space<vmem>>, %arg3: memref<8x128xf32, #tpu.memory_space<vmem>>) attributes {dimension_semantics = [#tpu.dimension_semantics<parallel>, #tpu.dimension_semantics<arbitrary>], iteration_bounds = array<i64: 2, 1>, scalar_prefetch = 0 : i64, scratch_operands = 0 : i64, tpu.core_type = #tpu.core_type<tc>, window_params = [{transform_indices = @transform_0, window_bounds = array<i64: 8, 128>}, {transform_indices = @transform_1, window_bounds = array<i64: 8, 128>}]} {
    %c0_i32 = arith.constant 0 : i32
    %0 = arith.cmpi eq, %arg1, %c0_i32 : i32
    %1 = arith.extui %0 : i1 to i32
    %c0_i32_0 = arith.constant 0 : i32
    %2 = arith.cmpi ne, %1, %c0_i32_0 : i32
    scf.if %2 {
      %cst_6 = arith.constant 0.000000e+00 : f32
      %17 = vector.broadcast %cst_6 : f32 to vector<8x128xf32>
      %c0_7 = arith.constant 0 : index
      %c0_8 = arith.constant 0 : index
      %18 = vector.load %arg3[%c0_7, %c0_8] : memref<8x128xf32, #tpu.memory_space<vmem>>, vector<8x128xf32>
      tpu.vector_store %arg3[%c0_7, %c0_8], %17 {strides = array<i32>} : memref<8x128xf32, #tpu.memory_space<vmem>>, vector<8x128xf32>,
    } else {
    }
    %c0 = arith.constant 0 : index
    %c0_1 = arith.constant 0 : index
    %3 = vector.load %arg2[%c0, %c0_1] : memref<8x128xf32, #tpu.memory_space<vmem>>, vector<8x128xf32>
    %cst = arith.constant 0.125000104 : f32
    %4 = vector.broadcast %cst : f32 to vector<8x128xf32>
    %5 = arith.addf %3, %4 : vector<8x128xf32>
    %6 = math.log %5 : vector<8x128xf32>
    %c1_i32 = arith.constant 1 : i32
    %7 = arith.muli %arg0, %c1_i32 : i32
    %8 = arith.addi %7, %arg1 : i32
    %c1024_i32 = arith.constant 1024 : i32
    %9 = arith.muli %8, %c1024_i32 : i32
    %c136_i32 = arith.constant 136 : i32
    %10 = arith.subi %c136_i32, %9 : i32
    %c1024_i32_2 = arith.constant 1024 : i32
    %11 = arith.cmpi sge, %10, %c1024_i32_2 : i32
    %12 = arith.extui %11 : i1 to i32
    %c0_i32_3 = arith.constant 0 : i32
    %13 = arith.cmpi ne, %12, %c0_i32_3 : i32
    scf.if %13 {
      %c0_6 = arith.constant 0 : index
      %c0_7 = arith.constant 0 : index
      %17 = vector.load %arg3[%c0_6, %c0_7] : memref<8x128xf32, #tpu.memory_space<vmem>>, vector<8x128xf32>
      %18 = vector.shape_cast %6 : vector<8x128xf32> to vector<1x8x128xf32>
      %cst_8 = arith.constant dense<0.000000e+00> : vector<8x128xf32>
      %19 = vector.multi_reduction <add>, %18, %cst_8 [0] : vector<1x8x128xf32> to vector<8x128xf32>
      %20 = arith.addf %17, %19 : vector<8x128xf32>
      %c0_9 = arith.constant 0 : index
      %c0_10 = arith.constant 0 : index
      %21 = vector.load %arg3[%c0_9, %c0_10] : memref<8x128xf32, #tpu.memory_space<vmem>>, vector<8x128xf32>
      tpu.vector_store %arg3[%c0_9, %c0_10], %20 {strides = array<i32>} : memref<8x128xf32, #tpu.memory_space<vmem>>, vector<8x128xf32>,
    } else {
    }
    %c1024_i32_4 = arith.constant 1024 : i32
    %14 = arith.cmpi slt, %10, %c1024_i32_4 : i32
    %15 = arith.extui %14 : i1 to i32
    %c0_i32_5 = arith.constant 0 : i32
    %16 = arith.cmpi ne, %15, %c0_i32_5 : i32
    scf.if %16 {
      %17 = tpu.iota {dimensions = array<i32: 0>} : vector<8x128xi32>
      %c128_i32 = arith.constant 128 : i32
      %18 = vector.broadcast %c128_i32 : i32 to vector<8x128xi32>
      %19 = arith.muli %17, %18 : vector<8x128xi32>
      %20 = tpu.iota {dimensions = array<i32: 1>} : vector<8x128xi32>
      %21 = arith.addi %19, %20 : vector<8x128xi32>
      %22 = vector.broadcast %10 : i32 to vector<8x128xi32>
      %23 = arith.cmpi slt, %21, %22 : vector<8x128xi32>
      %cst_6 = arith.constant 0.000000e+00 : f32
      %24 = vector.broadcast %cst_6 : f32 to vector<8x128xf32>
      %25 = arith.select %23, %6, %24 : vector<8x128xi1>, vector<8x128xf32>
      %c0_7 = arith.constant 0 : index
      %c0_8 = arith.constant 0 : index
      %26 = vector.load %arg3[%c0_7, %c0_8] : memref<8x128xf32, #tpu.memory_space<vmem>>, vector<8x128xf32>
      %27 = vector.shape_cast %25 : vector<8x128xf32> to vector<1x8x128xf32>
      %cst_9 = arith.constant dense<0.000000e+00> : vector<8x128xf32>
      %28 = vector.multi_reduction <add>, %27, %cst_9 [0] : vector<1x8x128xf32> to vector<8x128xf32>
      %29 = arith.addf %26, %28 : vector<8x128xf32>
      %c0_10 = arith.constant 0 : index
      %c0_11 = arith.constant 0 : index
      %30 = vector.load %arg3[%c0_10, %c0_11] : memref<8x128xf32, #tpu.memory_space<vmem>>, vector<8x128xf32>
      tpu.vector_store %arg3[%c0_10, %c0_11], %29 {strides = array<i32>} : memref<8x128xf32, #tpu.memory_space<vmem>>, vector<8x128xf32>,
    } else {
    }
    return
  }
  func.func @transform_0(%arg0: i32, %arg1: i32) -> (i32, i32) {
    %c1_i32 = arith.constant 1 : i32
    %0 = arith.muli %arg0, %c1_i32 : i32
    %1 = arith.addi %0, %arg1 : i32
    %c0_i32 = arith.constant 0 : i32
    %c0_i32_0 = arith.constant 0 : i32
    return %1, %c0_i32 : i32, i32
  }
  func.func @transform_1(%arg0: i32, %arg1: i32) -> (i32, i32) {
    %c0_i32 = arith.constant 0 : i32
    %c0_i32_0 = arith.constant 0 : i32
    return %arg0, %c0_i32 : i32, i32
  }
}

</mosaic_0001>

<bundles_post_ra>
// kernel: tpu_custom_call.1
= control target key start
LH: loop header
LB: loop body
LE: loop exit
PB: predicated region body
PF: predicated region fallthrough
CT: control target
= control target key end

     0   :  { %6 = vsyncpa [#allocation3], 0  ;;  %s661_s0 = inlined_call_operand.hbm [shape: f32[16,128], index: 0, kind: input, shape index: {}]   ;;  %s662_s1 = inlined_call_operand.hbm [shape: f32[16,128], index: 1, kind: output, shape index: {}]  }
   0x1   :  { %8 = vsyncpa [#allocation3 + $0x1], 0 }
   0x2   :  { %9 = vsyncpa [#allocation4], 0 }
   0x3   :  { %11 = vsyncpa [#allocation4 + $0x1], 0  ;;  %s486_s6 = smov 0   ;;  %s488_s7 = smov 0  }
   0x4   :  { %s490_s8 = smov 0   ;;  %s492_s9 = smov 0  }
   0x5   :  { %s494_s10 = smov 0   ;;  %s496_s11 = smov 0  }
   0x6 LB: > { %s278_s12 = sadd.s32 4294967295, %s471_s11   ;;  %s279_s13 = sadd.s32 4294967294, %s471_s11   ;;  %s471_s11 = sphi %s496_s11, %s17_s11   ;;  %s467_s10 = sphi %s494_s10, %s678_s10   ;;  %s463_s9 = sphi %s492_s9, %s677_s9   ;;  %s459_s8 = sphi %s490_s8, %s676_s8   ;;  %s455_s7 = sphi %s488_s7, %s675_s7   ;;  %s451_s6 = sphi %s486_s6, %s674_s6  }
   0x7   : > { %s29_s14 = sadd.s32 1, %s467_s10  ;;  %s38_s15 = sadd.s32 1, %s459_s8 }
   0x8   : > { %p31_p0 = scmp.ge.s32.totalorder %s29_s14, 2  ;;  %p45_p1 = scmp.ne.s32.totalorder %s459_s8, %s455_s7 }
   0x9   : > { %p46_p2 = scmp.eq.s32.totalorder %s471_s11, 0  ;;  %p51_p3 = scmp.ne.s32.totalorder %s455_s7, %s451_s6 }
   0xa   : > { %s680_s14 = smov (%p31_p0, %s29_s14), 0  ;;  %p52_p5 = scmp.eq.s32.totalorder %s278_s12, 0 }
   0xb   : > { %p527_p4 = por %p46_p2, %p45_p1  ;;  %s35_s17 = ssub.s32 %s467_s10, %s680_s14 }
   0xc   : > { %p75_p6 = scmp.eq.s32.totalorder %s278_s12, 1  ;;  %p36_p7 = scmp.eq.s32.totalorder %s35_s17, 0 }
   0xd   : > { %p533_p8 = por %p52_p5, %p51_p3  ;;  %p81_p10 = scmp.eq.s32.totalorder %s279_s13, 1 }
   0xe   : > { %p537_p9 = por %p75_p6, %p45_p1  ;;  %p306_p13 = scmp.lt.s32.totalorder %s471_s11, 2 }
   0xf   : > { %s542_s20 = scalar_select %p36_p7, %s459_s8, %s38_s15  }
  0x10   : > { %s666_s19 = scalar_select %p537_p9, 1, 0 }
  0x11   : > { %p544_p11 = por %p81_p10, %p51_p3  ;;  %s101_s22 = sand.u32 1, %s459_s8  }
  0x12   : > { %s282_s23 = sshll.u32 %s101_s22, 3  ;;  %s283_s24 = sshll.u32 %s467_s10, 7 }
  0x13   : > { %s667_s21 = scalar_select %p544_p11, 1, 0 }
  0x14   : > { %s555_s27 = scalar_lea.hbm %s661_s0, %s283_s24  ;;  %s105_s28 = scalar_lea.vmem [#allocation2], %s282_s23 }
  0x15   : > { %s113_s29 = sshll.u32 %s105_s28, 4  ;;  %p561_p0 = pnand %p306_p13, %p527_p4  ;;  %s557_s29 = int_to_ptr.vmem [resolvable:$true] %s113_s29 }
  0x16   : > { %s102_s2 = scalar_lea.sflag [#allocation3], %s101_s22  ;;  %s359_s3 = scalar_lea.hbm %s555_s27, 128 }
  0x17   : > { %p360_p3 = scmp.ne.s32.totalorder %s555_s27, %s359_s3  ;;  %p361_p5 = pneg %p561_p0 }
  0x18   : > { %s364_s12 = scalar_lea.hbm %s661_s0, 256  ;;  %p365_p4 = scmp.lt.u32.totalorder %s555_s27, %s661_s0 }
  0x19   : > { %p362_p6 = pnand %p361_p5, %p360_p3  ;;  %p366_p10 = scmp.lt.u32.totalorder %s364_s12, %s359_s3 }
  0x1a   : > { %p368_p12 = scmp.lt.u32.totalorder %s359_s3, %s555_s27 }
  0x1b   : > { %p363_p7 = pneg %p362_p6  ;;  %p367_p13 = por %p366_p10, %p365_p4 }
  0x1d   : > { %p369_p1 = por %p368_p12, %p367_p13 }
  0x1f   : > { %p370_p2 = pnand %p369_p1, %p363_p7 }
  0x21   : > { %373 = shalt.err (!%p370_p2)
}
  0x22   : > { %s374_s16 = scalar_lea.vmem %s557_s29, 128  ;;  %s473_s17 = smov [#allocation2]  }
  0x23   : > { %p375_p3 = scmp.ne.s32.totalorder %s557_s29, %s374_s16  ;;  %s379_s22 = sshll.u32 %s473_s17, 4  ;;  %s380_s22 = int_to_ptr.vmem [resolvable:$false] %s379_s22 }
  0x24   : > { %s381_s23 = scalar_lea.vmem %s380_s22, 256  ;;  %p382_p9 = scmp.lt.s32.totalorder %s557_s29, %s380_s22 }
  0x25   : > { %p377_p6 = pnand %p375_p3, %p361_p5  ;;  %p383_p4 = scmp.lt.s32.totalorder %s381_s23, %s374_s16 }
  0x27   : > { %p378_p11 = pneg %p377_p6  ;;  %p384_p10 = por %p383_p4, %p382_p9 }
  0x29   : > { %p385_p12 = pnand %p384_p10, %p378_p11 }
  0x2b   : > { %388 = shalt.err (!%p385_p12)
}
  0x2c   : > { %301 = dma.hbm_to_vmem [thread:$0]  (!%p561_p0), %s555_s27, 128, %s557_s29, %s102_s2  }
  0x2d   : > { %p669_p1 = scmp.lt.s32.totalorder %s471_s11, 3  ;;  %p670_p2 = scmp.ge.s32.totalorder %s471_s11, 1 }
  0x2f   : > { %p119_p5 = pnand %p670_p2, %p669_p1 }
  0x30   : > { %s597_s24 = sand.u32 (!%p119_p5), 1, %s455_s7  }
  0x31   : > { %122 = sbr.rel (%p119_p5) target bundleno = 115 (0x73), region = 24  ;;  %s285_s25 = sshll.u32 (!%p119_p5), %s597_s24, 3 }
  0x32   : > { %s125_s26 = scalar_lea.sflag (!%p119_p5), [#allocation3], %s597_s24  ;;  %s128_s28 = scalar_lea.vmem (!%p119_p5), [#allocation2], %s285_s25 }
  0x38   : > { %442 = dma.done.wait (%p533_p8), %s125_s26, 128  }
  0x39   : > { %444 = vsyncadd (%p533_p8), %s125_s26, 4294967168  ;;  %s287_s27 = sshll.u32 %s463_s9, 10  ;;  %s606_s29 = scalar_lea.vmem [#allocation5], %s285_s25  ;;  %v474_v0 = vmov 0.0   ;;  %v153_v1 = vld [vmem:[%s128_s28] sm:$0xff] }
  0x3a   : > { %152 = vst [vmem:[%s606_s29] sm:$0xff] %v474_v0  ;;  %s159_s30 = ssub.s32 136, %s287_s27  ;;  %v154_v2 = vadd.f32 0.1250001, %v153_v1 }
  0x3b   : > { %p288_p9 = scmp.lt.s32.totalorder %s159_s30, 1024 }
  0x3c   : > { %357 = vlog2.f32 %v154_v2 }
  0x41   : > { %163 = sbr.rel (%p288_p9) target bundleno = 76 (0x4c), region = 36  ;;  %v164_v5 = vld [vmem:[%s606_s29] sm:$0xff] (!%p288_p9) }
  0x46   : > { %v358_v3 = vpop.eup %357 }
  0x47   : > { %v156_v4 = vmul.f32 0.6931472, %v358_v3 }
  0x49   : > { %v166_v6 = vadd.f32 %v164_v5, %v156_v4 }
  0x4b   : > { %167 = vst [vmem:[%s606_s29] sm:$0xff] %v166_v6 }
  0x4c PF: > { %p289_p8 = scmp.ge.s32.totalorder %s159_s30, 1024 }
  0x4d   : > { %v172_v7 = vlaneseq (!%p289_p8)  ;;  %v178_v11 = vstv (!%p289_p8), %s159_s30 }
  0x4e   : > { %171 = sbr.rel (%p289_p8) target bundleno = 90 (0x5a), region = 40 }
  0x4f   : > { %v173_v8 = vshrl.u32 (!%p289_p8), %v172_v7, 7  ;;  %v176_v9 = vand.u32 (!%p289_p8), 127, %v172_v7 }
  0x51   : > { %v174_v10 = vmul.u32 (!%p289_p8), 128, %v173_v8 }
  0x52   : > { %v181_v13 = vld [vmem:[%s606_s29] sm:$0xff] (!%p289_p8) }
  0x53   : > { %v177_v12 = vadd.s32 (!%p289_p8), %v176_v9, %v174_v10 }
  0x55   : > { %vm179_vm0 = vcmp.lt.s32.totalorder %v177_v12, %v178_v11 }
  0x56   : > { %v180_v14 = vsel %vm179_vm0, %v156_v4, 0.0 }
  0x57   : > { %v183_v15 = vadd.f32 %v181_v13, %v180_v14 }
  0x59   : > { %184 = vst [vmem:[%s606_s29] sm:$0xff] %v183_v15 }
  0x5a PF: > { %s291_s18 = sshll.u32 %s463_s9, 7  ;;  %s199_s5 = sshll.u32 %s606_s29, 4  ;;  %s200_s5 = int_to_ptr.vmem [resolvable:$true] %s199_s5 }
  0x5b   : > { %s617_s4 = scalar_lea.hbm %s662_s1, %s291_s18  ;;  %s186_s12 = scalar_lea.sflag [#allocation4], %s597_s24 }
  0x5c   : > { %s389_s13 = scalar_lea.vmem %s200_s5, 128  ;;  %p671_p0 = scmp.ne.s32.totalorder %s666_s19, 0 }
  0x5d   : > { %p390_p11 = scmp.ne.s32.totalorder %s200_s5, %s389_s13  ;;  %s475_s15 = smov [#allocation5]  }
  0x5e   : > { %s393_s16 = sshll.u32 %s475_s15, 4  ;;  %s394_s16 = int_to_ptr.vmem [resolvable:$false] %s393_s16 }
  0x5f   : > { %p391_p7 = pnand %p390_p11, %p671_p0  ;;  %s395_s17 = scalar_lea.vmem %s394_s16, 256 }
  0x60   : > { %p396_p3 = scmp.lt.s32.totalorder %s200_s5, %s394_s16  ;;  %p397_p6 = scmp.lt.s32.totalorder %s395_s17, %s389_s13 }
  0x61   : > { %p392_p13 = pneg %p391_p7 }
  0x62   : > { %p398_p4 = por %p397_p6, %p396_p3 }
  0x64   : > { %p399_p10 = pnand %p398_p4, %p392_p13 }
  0x66   : > { %402 = shalt.err (!%p399_p10)
}
  0x67   : > { %s403_s9 = scalar_lea.hbm %s617_s4, 128  ;;  %s407_s24 = scalar_lea.hbm %s662_s1, 256 }
  0x68   : > { %p404_p12 = scmp.ne.s32.totalorder %s617_s4, %s403_s9  ;;  %p408_p5 = scmp.lt.u32.totalorder %s617_s4, %s662_s1 }
  0x69   : > { %p409_p9 = scmp.lt.u32.totalorder %s407_s24, %s403_s9  ;;  %p411_p11 = scmp.lt.u32.totalorder %s403_s9, %s617_s4 }
  0x6a   : > { %p405_p1 = pnand %p404_p12, %p671_p0 }
  0x6b   : > { %p410_p8 = por %p409_p9, %p408_p5 }
  0x6c   : > { %p406_p2 = pneg %p405_p1 }
  0x6d   : > { %p412_p7 = por %p411_p11, %p410_p8 }
  0x6f   : > { %p413_p13 = pnand %p412_p7, %p406_p2 }
  0x71   : > { %416 = shalt.err (!%p413_p13)
}
  0x72   : > { %296 = dma.vmem_to_hbm [thread:$0]  (%p671_p0), %s200_s5, 128, %s617_s4, %s186_s12  }
  0x73 PF: > { %s211_s28 = sand.u32 1, %s451_s6   ;;  %p672_p3 = scmp.ne.s32.totalorder %s667_s21, 0 }
  0x74   : > { %p673_p6 = scmp.ge.s32.totalorder %s471_s11, 2  ;;  %s212_s27 = scalar_lea.sflag [#allocation4], %s211_s28 }
  0x76   : > { %p303_p4 = pnand %p673_p6, %p672_p3 }
  0x78   : > { %446 = dma.done.wait (!%p303_p4), %s212_s27, 128  }
  0x79   : > { %448 = vsyncadd (!%p303_p4), %s212_s27, 4294967168  ;;  %s17_s11 = sadd.s32 1, %s471_s11   ;;  %s674_s6 = smov %s455_s7 }
  0x7a   : > { %p14_p10 = scmp.ge.s32.totalorder %s17_s11, 4   ;;  %s675_s7 = smov %s459_s8 }
  0x7b   : > { %s676_s8 = smov %s542_s20  ;;  %s677_s9 = smov %s467_s10 }
  0x7c   : > { %s678_s10 = smov %s680_s14  ;;  %16 = sbr.rel (!%p14_p10) target bundleno = 6 (0x6), region = 81 }
  0x83   :  { %217 = vsyncpa [#allocation3], 1 }
  0x84   :  { %219 = vsyncpa [#allocation3 + $0x1], 1 }
  0x85   :  { %220 = vsyncpa [#allocation4], 1 }
  0x86   :  { %222 = vsyncpa [#allocation4 + $0x1], 1 }

</bundles_post_ra>
